<compile_context>
chip_gen: v6e
topology: v6e:2x2x1
jax: 0.10.0
libtpu: 0.0.40
codegen_flags: <defaults>
</compile_context>

<pallas_src>
import jax
import jax.numpy as jnp
from jax.experimental import pallas as pl
from jax.experimental.pallas import tpu as pltpu


def _round_up(x, m):
    return ((x + m - 1) // m) * m


def _vmem_budget_bytes():
    """Per-generation VMEM budget for the streamed tiles."""
    cap = None
    try:
        info = pltpu.get_tpu_info()
        cap = int(getattr(info, "vmem_capacity_bytes", 0)) or None
    except Exception:
        cap = None
    if cap is None:
        cap = 64 << 20                       # conservative fallback = v7x physical VMEM
    # Use at most half the physical VMEM for our double-buffered tiles, capped at
    # 48 MiB so the same tiling fits v7x's 64 MiB with compiler headroom everywhere.
    return min(cap // 2, 48 << 20)


def _choose_block_rows(num_classes, pred_itemsize, vmem_budget, max_rows=8192):
    """Biggest sublane-aligned batch-tile TB whose double-buffered pred tile plus
    the lane-padded (TB, 1) int32 target tile fits the VMEM budget."""
    c_pad = max(_round_up(num_classes, 128), 128)        # pred lanes pad to 128
    # TODO(synk): single-buffer the tiny target tile (pipeline_mode=pl.Buffered(1))
    # to reclaim its 512 B/row padded footprint for a larger pred TB on v7x.
    per_row = 2 * (c_pad * pred_itemsize + 128 * 4)      # x2: double buffering
    tb = vmem_budget // per_row
    return max(8, min(max_rows, (tb // 8) * 8))


def _nll_loss_kernel(target_ref, pred_ref, acc_ref):
    # target_ref: (TB, 1) i32 (padded rows hold -1), pred_ref: (TB, C) f32/bf16,
    # acc_ref: (8, C) f32 output block, resident across the whole grid.
    t = pl.program_id(0)

    @pl.when(t == 0)
    def _():
        acc_ref[...] = jnp.zeros_like(acc_ref)

    pred = pred_ref[...]                                   # native dtype; no full-tile upcast
    tb, c = pred.shape
    pred3 = pred.reshape(tb // 8, 8, c)                    # split sublane groups
    tgt3 = target_ref[...].reshape(tb // 8, 8, 1)
    col = jax.lax.broadcasted_iota(jnp.int32, (1, 8, c), 2)  # small; broadcast over groups
    # one-hot select pred[i, target[i]]; padded/OOB rows (target == -1) pick 0, and
    # select is safe against NaN/Inf garbage in the unselected (ragged-tail) rows.
    picked = jnp.where(col == tgt3, pred3, jnp.zeros_like(pred3))
    # fold the 8-row groups with pure VPU adds; upcast only the (8, C) partial.
    acc_ref[...] += jnp.sum(picked, axis=0).astype(jnp.float32)


def nll_loss(pred, target):
    """pred: (B, C) log-probs (f32/bf16), target: (B,) integer class ids -> scalar f32.

    Matches F.nll_loss(pred, target) with mean reduction for targets in [0, C).
    # TODO(synk): PyTorch's ignore_index=-100 / out-of-range target errors are not
    # replicated; out-of-range targets here silently contribute 0 to the sum.
    """
    B, C = pred.shape
    target_i32 = jnp.asarray(target).astype(jnp.int32).reshape(B, 1)

    budget = _vmem_budget_bytes()
    b_pad8 = _round_up(B, 8)
    tb = min(_choose_block_rows(C, jnp.dtype(pred.dtype).itemsize, budget), b_pad8)
    num_tiles = pl.cdiv(b_pad8, tb)

    # pred: pad at most 7 rows (sublane alignment only) -- no full extra HBM pass.
    pred_p = pred if b_pad8 == B else jnp.pad(pred, ((0, b_pad8 - B), (0, 0)))
    # target: pad the tiny (4 B/row) array to a whole number of blocks with the -1
    # sentinel so the ragged pred tail is never selected.
    t_rows = num_tiles * tb
    tgt_p = (target_i32 if t_rows == B
             else jnp.pad(target_i32, ((0, t_rows - B), (0, 0)), constant_values=-1))

    partial = pl.pallas_call(
        _nll_loss_kernel,
        out_shape=jax.ShapeDtypeStruct((8, C), jnp.float32),
        grid_spec=pltpu.PrefetchScalarGridSpec(
            num_scalar_prefetch=0,
            grid=(num_tiles,),
            in_specs=[
                pl.BlockSpec((tb, 1), lambda t: (t, 0)),   # target (tiny)
                pl.BlockSpec((tb, C), lambda t: (t, 0)),   # pred (streamed)
            ],
            out_specs=pl.BlockSpec((8, C), lambda t: (0, 0)),  # resident accumulator
        ),
        compiler_params=pltpu.CompilerParams(
            dimension_semantics=("arbitrary",),
            vmem_limit_bytes=int(budget + (16 << 20)),
        ),
    )(tgt_p, pred_p)

    # Finalize (negate + mean over the *true* batch size) in the wrapper.
    return jnp.sum(partial) * (-1.0 / B)


class GetLoss:
    """JAX/Pallas equivalent of models/PN2_cls_ssg_shuffle.get_loss (no parameters)."""

    def __call__(self, pred, target, model=None):
        # `model` is accepted for API parity but unused, matching the PyTorch module.
        return nll_loss(pred, target)


if __name__ == "__main__":
    key = jax.random.PRNGKey(0)
    B, C = 8, 16  # small batch of log-probabilities over C classes
    k1, k2 = jax.random.split(key)

    logits = jax.random.normal(k1, (B, C), dtype=jnp.float32)
    pred = jax.nn.log_softmax(logits, axis=-1)               # nll_loss expects log-probs
    target = jax.random.randint(k2, (B,), 0, C, dtype=jnp.int32)

    loss_fn = GetLoss()
    loss = loss_fn(pred, target, model=None)
    loss = jax.block_until_ready(loss)

    # reference check in plain JAX
    ref = -jnp.mean(pred[jnp.arange(B), target])
    assert jnp.allclose(loss, ref, atol=1e-6, rtol=1e-6), (loss, ref)

    print("KERNEL_OK")
</pallas_src>

<mosaic_0001>
module attributes {stable_mosaic.version = 11 : i64} {
  func.func @_nll_loss_kernel(%arg0: i32, %arg1: memref<8x1xi32, #tpu.memory_space<vmem>>, %arg2: memref<8x16xf32, #tpu.memory_space<vmem>>, %arg3: memref<8x16xf32, #tpu.memory_space<vmem>>) attributes {dimension_semantics = [#tpu.dimension_semantics<arbitrary>], iteration_bounds = array<i64: 1>, scalar_prefetch = 0 : i64, scratch_operands = 0 : i64, tpu.core_type = #tpu.core_type<tc>, window_params = [{transform_indices = @transform_0, window_bounds = array<i64: 8, 1>}, {transform_indices = @transform_1, window_bounds = array<i64: 8, 16>}, {pipeline_mode = #tpu.pipeline_mode<synchronous>, transform_indices = @transform_2, window_bounds = array<i64: 8, 16>}]} {
    %c0_i32 = arith.constant 0 : i32
    %0 = arith.cmpi eq, %arg0, %c0_i32 : i32
    %1 = arith.extui %0 : i1 to i32
    %c0_i32_0 = arith.constant 0 : i32
    %2 = arith.cmpi ne, %1, %c0_i32_0 : i32
    scf.if %2 {
      %cst_9 = arith.constant 0.000000e+00 : f32
      %16 = vector.broadcast %cst_9 : f32 to vector<8x16xf32>
      %c0_10 = arith.constant 0 : index
      %c0_11 = arith.constant 0 : index
      %17 = vector.load %arg3[%c0_10, %c0_11] : memref<8x16xf32, #tpu.memory_space<vmem>>, vector<8x16xf32>
      tpu.vector_store %arg3[%c0_10, %c0_11], %16 {strides = array<i32>} : memref<8x16xf32, #tpu.memory_space<vmem>>, vector<8x16xf32>,
    } else {
    }
    %c0 = arith.constant 0 : index
    %c0_1 = arith.constant 0 : index
    %3 = vector.load %arg2[%c0, %c0_1] : memref<8x16xf32, #tpu.memory_space<vmem>>, vector<8x16xf32>
    %4 = vector.shape_cast %3 : vector<8x16xf32> to vector<1x8x16xf32>
    %c0_2 = arith.constant 0 : index
    %c0_3 = arith.constant 0 : index
    %5 = vector.load %arg1[%c0_2, %c0_3] : memref<8x1xi32, #tpu.memory_space<vmem>>, vector<8x1xi32>
    %6 = vector.shape_cast %5 : vector<8x1xi32> to vector<1x8x1xi32>
    %7 = tpu.iota {dimensions = array<i32: 2>} : vector<1x8x16xi32>
    %8 = vector.broadcast %6 : vector<1x8x1xi32> to vector<1x8x16xi32>
    %9 = arith.cmpi eq, %7, %8 : vector<1x8x16xi32>
    %cst = arith.constant 0.000000e+00 : f32
    %10 = vector.broadcast %cst : f32 to vector<1x8x16xf32>
    %11 = arith.select %9, %4, %10 : vector<1x8x16xi1>, vector<1x8x16xf32>
    %c0_4 = arith.constant 0 : index
    %c0_5 = arith.constant 0 : index
    %12 = vector.load %arg3[%c0_4, %c0_5] : memref<8x16xf32, #tpu.memory_space<vmem>>, vector<8x16xf32>
    %cst_6 = arith.constant dense<0.000000e+00> : vector<8x16xf32>
    %13 = vector.multi_reduction <add>, %11, %cst_6 [0] : vector<1x8x16xf32> to vector<8x16xf32>
    %14 = arith.addf %12, %13 : vector<8x16xf32>
    %c0_7 = arith.constant 0 : index
    %c0_8 = arith.constant 0 : index
    %15 = vector.load %arg3[%c0_7, %c0_8] : memref<8x16xf32, #tpu.memory_space<vmem>>, vector<8x16xf32>
    tpu.vector_store %arg3[%c0_7, %c0_8], %14 {strides = array<i32>} : memref<8x16xf32, #tpu.memory_space<vmem>>, vector<8x16xf32>,
    return
  }
  func.func @transform_0(%arg0: i32) -> (i32, i32) {
    %c0_i32 = arith.constant 0 : i32
    %c0_i32_0 = arith.constant 0 : i32
    return %arg0, %c0_i32 : i32, i32
  }
  func.func @transform_1(%arg0: i32) -> (i32, i32) {
    %c0_i32 = arith.constant 0 : i32
    %c0_i32_0 = arith.constant 0 : i32
    return %arg0, %c0_i32 : i32, i32
  }
  func.func @transform_2(%arg0: i32) -> (i32, i32) {
    %c0_i32 = arith.constant 0 : i32
    %c0_i32_0 = arith.constant 0 : i32
    %c0_i32_1 = arith.constant 0 : i32
    return %c0_i32, %c0_i32_0 : i32, i32
  }
}

</mosaic_0001>

<bundles_post_ra>
// kernel: tpu_custom_call.1
= control target key start
LH: loop header
LB: loop body
LE: loop exit
PB: predicated region body
PF: predicated region fallthrough
CT: control target
= control target key end

     0   :  { %vm16_vm0 = vcmask 130048   ;;  %v72_v1 = vmov 0   ;;  %v73_v2 = vmov 0.0   ;;  %s101_s0 = inlined_call_operand.vmem [shape: s32[8,1], index: 0, kind: input, shape index: {}]   ;;  %s102_s1 = inlined_call_operand.vmem [shape: f32[8,16], index: 1, kind: input, shape index: {}]   ;;  %s103_s2 = inlined_call_operand.hbm [shape: f32[8,16], index: 2, kind: output, shape index: {}]  }
   0x1   :  { %v19_v0 = vld [vmem:[%s101_s0] sm:$0xff]  ;;  %49 = vset.pattern.permute.xlu0 %v72_v1  ;;  %17 = vst.msk [vmem:[#allocation2] sm:$0xff] %vm16_vm0, %v73_v2 }
   0x2   :  { %7 = vsyncpa [#allocation3], 0  ;;  %23 = vperm.xlu0 %49, %v19_v0   ;;  %v20_v3 = vlaneseq  ;;  %v18_v5 = vld [vmem:[%s102_s1] sm:$0xff]  ;;  %s74_s13 = smov [#allocation2]  }
   0x3   :  { %s38_s14 = sshll.u32 %s74_s13, 4  ;;  %s39_s14 = int_to_ptr.vmem [resolvable:$true] %s38_s14 }
   0x4   :  { %v21_v4 = vand.u32 127, %v20_v3  ;;  %s50_s0 = scalar_lea.vmem %s39_s14, 128  ;;  %p55_p1 = scmp.lt.s32.totalorder %s39_s14, %s39_s14 }
   0x5   :  { %p51_p0 = scmp.ne.s32.totalorder %s39_s14, %s50_s0  ;;  %p56_p2 = scmp.lt.s32.totalorder %s50_s0, %s50_s0 }
   0x7   :  { %p57_p3 = por %p56_p2, %p55_p1 }
   0x8   :  { %v27_v7 = vld [vmem:[#allocation2] sm:$0xff] }
   0x9   :  { %p58_p4 = pnand %p57_p3, %p51_p0 }
  0x7d   :  { %v24_v6 = vpop.permute.xlu0 %23 }
  0x7e   :  { %vm25_vm1 = vcmp.eq.s32.totalorder %v21_v4, %v24_v6 }
  0x7f   :  { %v26_v8 = vsel %vm25_vm1, %v18_v5, 0.0 }
  0x80   :  { %v29_v9 = vadd.f32 %v27_v7, %v26_v8 }
  0x82   :  { %31 = vst.msk [vmem:[#allocation2] sm:$0xff] %vm16_vm0, %v29_v9 }
  0x83   :  { %61 = shalt.err (!%p58_p4)
}
  0x84   :  { %41 = dma.vmem_to_hbm [thread:$0]  %s39_s14, 128, %s103_s2, [#allocation3]  }
  0x85   :  { %70 = dma.done.wait [#allocation3], 128  }
  0x86   :  { %71 = vsyncadd [#allocation3], 4294967168 }
  0x87   :  { %45 = vsyncpa [#allocation3], 1 }

</bundles_post_ra>
